<compile_context>
chip_gen: v7x
topology: tpu7x:2x2x1
jax: 0.10.0
libtpu: 0.0.40
codegen_flags: <defaults>
</compile_context>

<pallas_src>
import jax
import jax.numpy as jnp
from jax.experimental import pallas as pl
from jax.experimental.pallas import tpu as pltpu


def add_conv1x1_kernel(a_ref, b_ref, w_ref, o_ref):
    # Fused elementwise add (VPU) + 1x1-conv-as-matmul (MXU), computed as
    # W (tn, C_in) @ X (C_in, H*W): no transposes needed anywhere.
    x = a_ref[0] + b_ref[0]                               # (C_in, HW) f32
    o_ref[0] = jnp.dot(
        w_ref[...], x, preferred_element_type=jnp.float32
    ).astype(o_ref.dtype)                                 # (tn, HW)


def _pick_cout_tile(c_out):
    # Prefer ~4 tiles over C_out: enough for BlockSpec double-buffering to
    # hide the weight DMA / output writeback, and >=2 tiles per TensorCore on
    # v7x. Tile must be a multiple of 8 (sublane alignment).
    for n_tiles in (4, 3, 6, 2, 8, 7, 5):
        if c_out % n_tiles == 0 and (c_out // n_tiles) % 8 == 0:
            return c_out // n_tiles
    return c_out


def add_conv1x1(x556, x541, weight):
    """x556, x541: (N, C_in, H, W) f32; weight: (C_out, C_in, 1, 1), bias=None.

    Returns conv2d(x556 + x541, weight) with 1x1 kernel, stride 1, in NCHW.
    Kept in f32 (matches PyTorch f32 conv semantics); bf16 operand cast was
    considered but would break 1e-4 accuracy for K=224 accumulation.
    """
    N, C_in, H, W = x556.shape
    C_out = weight.shape[0]
    HW = H * W

    # Free reshapes only (layout-preserving).
    a = x556.reshape(N, C_in, HW)
    b = x541.reshape(N, C_in, HW)
    w = weight.reshape(C_out, C_in)

    tn = _pick_cout_tile(C_out)
    grid = (N, C_out // tn)

    out = pl.pallas_call(
        add_conv1x1_kernel,
        out_shape=jax.ShapeDtypeStruct((N, C_out, HW), x556.dtype),
        grid_spec=pltpu.PrefetchScalarGridSpec(
            num_scalar_prefetch=0,
            grid=grid,
            in_specs=[
                # Activations: full (C_in, HW) slab per batch element, resident
                # across the C_out-tile axis (index_map ignores j -> loaded once).
                pl.BlockSpec((1, C_in, HW), lambda n, j: (n, 0, 0)),
                pl.BlockSpec((1, C_in, HW), lambda n, j: (n, 0, 0)),
                # Weight: tiled over C_out rows so its DMA pipelines with compute.
                pl.BlockSpec((tn, C_in), lambda n, j: (j, 0)),
            ],
            out_specs=pl.BlockSpec((1, tn, HW), lambda n, j: (n, j, 0)),
        ),
        compiler_params=pltpu.CompilerParams(
            # No reduction axis: both axes independent -> parallel (lets v7x
            # split C_out tiles across its two TensorCores; no-op on v5e/v6e).
            dimension_semantics=("parallel", "parallel"),
        ),
    )(a, b, w)

    return out.reshape(N, C_out, H, W)


if __name__ == "__main__":
    # Shapes implied by the module: Conv2d(224 -> 1344, 1x1), input 1x224x14x14.
    key = jax.random.PRNGKey(0)
    k1, k2, k3 = jax.random.split(key, 3)

    N, C_in, H, W, C_out = 1, 224, 14, 14, 1344
    x556 = jax.random.normal(k1, (N, C_in, H, W), dtype=jnp.float32)
    x541 = jax.random.normal(k2, (N, C_in, H, W), dtype=jnp.float32)
    # Deterministic Conv2d weight init (kaiming-uniform-like bound), bias=False.
    bound = 1.0 / (C_in ** 0.5)
    weight = jax.random.uniform(
        k3, (C_out, C_in, 1, 1), minval=-bound, maxval=bound, dtype=jnp.float32
    )

    out = add_conv1x1(x556, x541, weight)
    jax.block_until_ready(out)

    # Sanity check against plain-JAX reference (1x1 conv == channel matmul).
    ref = jnp.einsum(
        "nchw,oc->nohw", x556 + x541, weight.reshape(C_out, C_in)
    )
    assert out.shape == (N, C_out, H, W)
    assert jnp.allclose(out, ref, atol=1e-4, rtol=1e-4)

    print("KERNEL_OK")
</pallas_src>

<mosaic_0001>
module attributes {stable_mosaic.version = 11 : i64} {
  func.func @add_conv1x1_kernel(%arg0: i32, %arg1: i32, %arg2: memref<1x224x196xf32, #tpu.memory_space<vmem>>, %arg3: memref<1x224x196xf32, #tpu.memory_space<vmem>>, %arg4: memref<336x224xf32, #tpu.memory_space<vmem>>, %arg5: memref<1x336x196xf32, #tpu.memory_space<vmem>>) attributes {dimension_semantics = [#tpu.dimension_semantics<parallel>, #tpu.dimension_semantics<parallel>], iteration_bounds = array<i64: 1, 4>, scalar_prefetch = 0 : i64, scratch_operands = 0 : i64, tpu.core_type = #tpu.core_type<tc>, window_params = [{transform_indices = @transform_0, window_bounds = array<i64: 1, 224, 196>}, {transform_indices = @transform_1, window_bounds = array<i64: 1, 224, 196>}, {transform_indices = @transform_2, window_bounds = array<i64: 336, 224>}, {transform_indices = @transform_3, window_bounds = array<i64: 1, 336, 196>}]} {
    %c0 = arith.constant 0 : index
    %c0_0 = arith.constant 0 : index
    %c0_1 = arith.constant 0 : index
    %0 = vector.load %arg2[%c0, %c0_0, %c0_1] : memref<1x224x196xf32, #tpu.memory_space<vmem>>, vector<1x224x196xf32>
    %1 = vector.shape_cast %0 : vector<1x224x196xf32> to vector<224x196xf32>
    %c0_2 = arith.constant 0 : index
    %c0_3 = arith.constant 0 : index
    %c0_4 = arith.constant 0 : index
    %2 = vector.load %arg3[%c0_2, %c0_3, %c0_4] : memref<1x224x196xf32, #tpu.memory_space<vmem>>, vector<1x224x196xf32>
    %3 = vector.shape_cast %2 : vector<1x224x196xf32> to vector<224x196xf32>
    %4 = arith.addf %1, %3 : vector<224x196xf32>
    %c0_5 = arith.constant 0 : index
    %c0_6 = arith.constant 0 : index
    %5 = vector.load %arg4[%c0_5, %c0_6] : memref<336x224xf32, #tpu.memory_space<vmem>>, vector<336x224xf32>
    %cst = arith.constant dense<0.000000e+00> : vector<336x196xf32>
    %6 = tpu.matmul %5, %4, %cst {dimension_numbers = #tpu.dot_dimension_numbers<[1], [0], [0], [1], [0, 0, 1, 1], [], []>} : vector<336x224xf32>, vector<224x196xf32>, vector<336x196xf32> -> vector<336x196xf32>
    %c0_7 = arith.constant 0 : index
    %c0_8 = arith.constant 0 : index
    %c0_9 = arith.constant 0 : index
    %7 = vector.load %arg5[%c0_7, %c0_8, %c0_9] : memref<1x336x196xf32, #tpu.memory_space<vmem>>, vector<1x336x196xf32>
    %8 = vector.shape_cast %7 : vector<1x336x196xf32> to vector<336x196xf32>
    %9 = vector.shape_cast %6 : vector<336x196xf32> to vector<1x336x196xf32>
    tpu.vector_store %arg5[%c0_7, %c0_8, %c0_9], %9 {strides = array<i32>} : memref<1x336x196xf32, #tpu.memory_space<vmem>>, vector<1x336x196xf32>,
    return
  }
  func.func @transform_0(%arg0: i32, %arg1: i32) -> (i32, i32, i32) {
    %c0_i32 = arith.constant 0 : i32
    %c0_i32_0 = arith.constant 0 : i32
    %c0_i32_1 = arith.constant 0 : i32
    return %arg0, %c0_i32, %c0_i32_0 : i32, i32, i32
  }
  func.func @transform_1(%arg0: i32, %arg1: i32) -> (i32, i32, i32) {
    %c0_i32 = arith.constant 0 : i32
    %c0_i32_0 = arith.constant 0 : i32
    %c0_i32_1 = arith.constant 0 : i32
    return %arg0, %c0_i32, %c0_i32_0 : i32, i32, i32
  }
  func.func @transform_2(%arg0: i32, %arg1: i32) -> (i32, i32) {
    %c0_i32 = arith.constant 0 : i32
    %c0_i32_0 = arith.constant 0 : i32
    return %arg1, %c0_i32 : i32, i32
  }
  func.func @transform_3(%arg0: i32, %arg1: i32) -> (i32, i32, i32) {
    %c0_i32 = arith.constant 0 : i32
    %c0_i32_0 = arith.constant 0 : i32
    return %arg0, %arg1, %c0_i32 : i32, i32, i32
  }
}

</mosaic_0001>

<bundles_post_ra>
// kernel: tpu_custom_call.1
= control target key start
LH: loop header
LB: loop body
LE: loop exit
PB: predicated region body
PF: predicated region fallthrough
CT: control target
= control target key end

     0   :  { %s1348_s12 = smov 0   ;;  %s1350_s13 = smov 0   ;;  %s1993_s0 = inlined_call_operand.vmem [shape: f32[1,224,196], index: 0, kind: input, shape index: {}]   ;;  %s1994_s1 = inlined_call_operand.vmem [shape: f32[1,224,196], index: 1, kind: input, shape index: {}]   ;;  %s1995_s2 = inlined_call_operand.vmem [shape: f32[1344,224], index: 2, kind: input, shape index: {}]   ;;  %s1996_s3 = inlined_call_operand.vmem [shape: f32[1,1344,196], index: 3, kind: output, shape index: {}]  }
   0x1   :  { %s1352_s14 = smov 0  }
   0x2 LB: > { %s22_s15 = sadd.s32 1, %s1322_s13  ;;  %p1145_p0 = scmp.ge.s32.totalorder %s1326_s14, 1  ;;  %s1326_s14 = sphi %s1352_s14, %s13_s14   ;;  %s1322_s13 = sphi %s1350_s13, %s1999_s13   ;;  %s1318_s12 = sphi %s1348_s12, %s1998_s12  }
   0x3   : > { %p23_p1 = scmp.ge.s32.totalorder %s22_s15, 4  ;;  %p173_p2 = scmp.lt.s32.totalorder %s1326_s14, 5 }
   0x5   : > { %s2001_s15 = smov (%p23_p1, %s22_s15), 0  ;;  %p174_p3 = pnand %p1145_p0, %p173_p2 }
   0x6   : > { %v242_v0 = vld [vmem:[%s1993_s0 + $0x8] sm:$0xff] (!%p174_p3)  ;;  %v244_v1 = vld [vmem:[%s1993_s0 + $0x18] sm:$0xff] (!%p174_p3)  ;;  %v241_v5 = vld [vmem:[%s1993_s0] sm:$0xff] (!%p174_p3)  ;;  %s223_s5 = smul.u32 (!%p174_p3), 42, %s1318_s12  ;;  %vm493_vm0 = vcmask (!%p174_p3), 785408   ;;  %vm938_vm1 = vcmask (!%p174_p3), 556032  }
   0x7   : > { %177 = sbr.rel (%p174_p3) target bundleno = 362 (0x16a), region = 32  ;;  %v298_v2 = vld [vmem:[%s1994_s1 + $0x8] sm:$0xff] (!%p174_p3)  ;;  %v300_v3 = vld [vmem:[%s1994_s1 + $0x18] sm:$0xff] (!%p174_p3)  ;;  %v243_v6 = vld [vmem:[%s1993_s0 + $0x10] sm:$0xff] (!%p174_p3) }
   0x8   : > { %v354_v4 = vadd.f32 (!%p174_p3), %v298_v2, %v242_v0  ;;  %v356_v7 = vadd.f32 (!%p174_p3), %v300_v3, %v244_v1  ;;  %v297_v8 = vld [vmem:[%s1994_s1] sm:$0xff] (!%p174_p3)  ;;  %v299_v9 = vld [vmem:[%s1994_s1 + $0x10] sm:$0xff] (!%p174_p3)  ;;  %v246_v10 = vld [vmem:[%s1993_s0 + $0x28] sm:$0xff] (!%p174_p3)  ;;  %p1557_p4 = scmp.lt.s32.totalorder (!%p174_p3), %s223_s5, 167 }
   0x9   : > { %v353_v11 = vadd.f32 (!%p174_p3), %v297_v8, %v241_v5  ;;  %v355_v12 = vadd.f32 (!%p174_p3), %v299_v9, %v243_v6  ;;  %v248_v13 = vld [vmem:[%s1993_s0 + $0x38] sm:$0xff] (!%p174_p3)  ;;  %v302_v14 = vld [vmem:[%s1994_s1 + $0x28] sm:$0xff] (!%p174_p3)  ;;  %v245_v19 = vld [vmem:[%s1993_s0 + $0x20] sm:$0xff] (!%p174_p3) }
   0xa   : > { %v304_v15 = vld [vmem:[%s1994_s1 + $0x38] sm:$0xff] (!%p174_p3)  ;;  %v1196_v16 = vpack.c.bf16 (!%p174_p3), %v356_v7, %v354_v4  ;;  %v358_v17 = vadd.f32 (!%p174_p3), %v302_v14, %v246_v10  ;;  %v247_v20 = vld [vmem:[%s1993_s0 + $0x30] sm:$0xff] (!%p174_p3)  ;;  %v301_v21 = vld [vmem:[%s1994_s1 + $0x20] sm:$0xff] (!%p174_p3) }
   0xb   : > { %v360_v18 = vadd.f32 (!%p174_p3), %v304_v15, %v248_v13  ;;  %v1198_v22 = vpack.c.bf16 (!%p174_p3), %v355_v12, %v353_v11  ;;  %v303_v23 = vld [vmem:[%s1994_s1 + $0x30] sm:$0xff] (!%p174_p3)  ;;  %v357_v24 = vadd.f32 (!%p174_p3), %v301_v21, %v245_v19  ;;  %v250_v25 = vld [vmem:[%s1993_s0 + $0x48] sm:$0xff] (!%p174_p3)  ;;  %v252_v26 = vld [vmem:[%s1993_s0 + $0x58] sm:$0xff] (!%p174_p3) }
   0xc   : > { %1197 = vmatprep.subr.bf16.mxu0 (!%p174_p3), %v1196_v16  ;;  %1252 = vmatprep.subr.bf16.mxu1 (!%p174_p3), %v1196_v16  ;;  %v359_v28 = vadd.f32 (!%p174_p3), %v303_v23, %v247_v20  ;;  %v306_v29 = vld [vmem:[%s1994_s1 + $0x48] sm:$0xff] (!%p174_p3)  ;;  %v308_v30 = vld [vmem:[%s1994_s1 + $0x58] sm:$0xff] (!%p174_p3)  ;;  %v249_v31 = vld [vmem:[%s1993_s0 + $0x40] sm:$0xff] (!%p174_p3) }
   0xd   : > { %v1200_v27 = vpack.c.bf16 (!%p174_p3), %v360_v18, %v358_v17  ;;  %1199 = vmatpush1.bf16.msra.mxu0 (!%p174_p3), %v1198_v22  ;;  %1266 = vmatpush1.bf16.msra.mxu1 (!%p174_p3), %v1198_v22  ;;  %v362_v32 = vadd.f32 (!%p174_p3), %v306_v29, %v250_v25  ;;  %v364_v33 = vadd.f32 (!%p174_p3), %v308_v30, %v252_v26  ;;  %v251_v34 = vld [vmem:[%s1993_s0 + $0x50] sm:$0xff] (!%p174_p3)  ;;  %v305_v35 = vld [vmem:[%s1994_s1 + $0x40] sm:$0xff] (!%p174_p3)  ;;  %v254_v40 = vld [vmem:[%s1993_s0 + $0x68] sm:$0xff] (!%p174_p3) }
   0xe   : > { %v307_v36 = vld [vmem:[%s1994_s1 + $0x50] sm:$0xff]  ;;  %v1202_v37 = vpack.c.bf16 %v359_v28, %v357_v24  ;;  %v361_v38 = vadd.f32 %v305_v35, %v249_v31  ;;  %v256_v41 = vld [vmem:[%s1993_s0 + $0x78] sm:$0xff]  ;;  %v310_v42 = vld [vmem:[%s1994_s1 + $0x68] sm:$0xff]  ;;  %s2003_s5 = smov (!%p1557_p4, %s223_s5), 167 }
   0xf   : > { %1201 = vmatprep.subr.bf16.mxu0 %v1200_v27  ;;  %1253 = vmatprep.subr.bf16.mxu1 %v1200_v27  ;;  %v363_v39 = vadd.f32 %v307_v36, %v251_v34  ;;  %v1204_v43 = vpack.c.bf16 %v364_v33, %v362_v32  ;;  %v312_v44 = vld [vmem:[%s1994_s1 + $0x78] sm:$0xff]  ;;  %v366_v45 = vadd.f32 %v310_v42, %v254_v40  ;;  %v253_v46 = vld [vmem:[%s1993_s0 + $0x60] sm:$0xff]  ;;  %v255_v47 = vld [vmem:[%s1993_s0 + $0x70] sm:$0xff]  ;;  %s1194_s10 = sshll.u32 %s2003_s5, 4 }
  0x10   : > { %v368_v48 = vadd.f32 %v312_v44, %v256_v41  ;;  %v309_v49 = vld [vmem:[%s1994_s1 + $0x60] sm:$0xff]  ;;  %v311_v50 = vld [vmem:[%s1994_s1 + $0x70] sm:$0xff]  ;;  %v258_v51 = vld [vmem:[%s1993_s0 + $0x88] sm:$0xff]  ;;  %s1642_s30 = scalar_lea.vmem %s1995_s2, %s1194_s10  ;;  %s1856_s24 = scalar_lea.vmem %s1996_s3, %s1194_s10 }
  0x11   : > { %1203 = vmatpush1.bf16.msra.mxu0 %v1202_v37  ;;  %1267 = vmatpush1.bf16.msra.mxu1 %v1202_v37  ;;  %v1206_v52 = vpack.c.bf16 %v363_v39, %v361_v38  ;;  %v365_v53 = vadd.f32 %v309_v49, %v253_v46  ;;  %v367_v54 = vadd.f32 %v311_v50, %v255_v47  ;;  %v260_v55 = vld [vmem:[%s1993_s0 + $0x98] sm:$0xff]  ;;  %v314_v56 = vld [vmem:[%s1994_s1 + $0x88] sm:$0xff]  ;;  %v257_v61 = vld [vmem:[%s1993_s0 + $0x80] sm:$0xff] }
  0x12   : > { %v316_v57 = vld [vmem:[%s1994_s1 + $0x98] sm:$0xff]  ;;  %1205 = vmatprep.subr.bf16.mxu0 %v1204_v43  ;;  %1254 = vmatprep.subr.bf16.mxu1 %v1204_v43  ;;  %v1208_v58 = vpack.c.bf16 %v368_v48, %v366_v45  ;;  %v370_v59 = vadd.f32 %v314_v56, %v258_v51  ;;  %v259_v62 = vld [vmem:[%s1993_s0 + $0x90] sm:$0xff]  ;;  %v313_v63 = vld [vmem:[%s1994_s1 + $0x80] sm:$0xff] }
  0x13   : > { %v372_v60 = vadd.f32 %v316_v57, %v260_v55  ;;  %v315_v0 = vld [vmem:[%s1994_s1 + $0x90] sm:$0xff]  ;;  %v262_v1 = vld [vmem:[%s1993_s0 + $0xa8] sm:$0xff]  ;;  %v264_v2 = vld [vmem:[%s1993_s0 + $0xb8] sm:$0xff]  ;;  %v1210_v5 = vpack.c.bf16 %v367_v54, %v365_v53  ;;  %v369_v6 = vadd.f32 %v313_v63, %v257_v61 }
  0x14   : > { %v318_v3 = vld [vmem:[%s1994_s1 + $0xa8] sm:$0xff]  ;;  %v320_v4 = vld [vmem:[%s1994_s1 + $0xb8] sm:$0xff]  ;;  %v371_v7 = vadd.f32 %v315_v0, %v259_v62  ;;  %v261_v8 = vld [vmem:[%s1993_s0 + $0xa0] sm:$0xff] }
  0x15   : > { %1207 = vmatpush1.bf16.msra.mxu0 %v1206_v52  ;;  %1268 = vmatpush1.bf16.msra.mxu1 %v1206_v52  ;;  %v263_v9 = vld [vmem:[%s1993_s0 + $0xb0] sm:$0xff]  ;;  %v1212_v10 = vpack.c.bf16 %v372_v60, %v370_v59  ;;  %v374_v11 = vadd.f32 %v318_v3, %v262_v1  ;;  %v376_v12 = vadd.f32 %v320_v4, %v264_v2  ;;  %v317_v13 = vld [vmem:[%s1994_s1 + $0xa0] sm:$0xff]  ;;  %v266_v15 = vld [vmem:[%s1993_s0 + $0xc8] sm:$0xff] }
  0x16   : > { %1209 = vmatprep.subr.bf16.mxu0 %v1208_v58  ;;  %1255 = vmatprep.subr.bf16.mxu1 %v1208_v58  ;;  %v319_v14 = vld [vmem:[%s1994_s1 + $0xb0] sm:$0xff]  ;;  %v268_v16 = vld [vmem:[%s1993_s0 + $0xd8] sm:$0xff]  ;;  %v322_v17 = vld [vmem:[%s1994_s1 + $0xc8] sm:$0xff]  ;;  %v1214_v19 = vpack.c.bf16 %v371_v7, %v369_v6  ;;  %v373_v20 = vadd.f32 %v317_v13, %v261_v8 }
  0x17   : > { %v324_v18 = vld [vmem:[%s1994_s1 + $0xd8] sm:$0xff]  ;;  %v375_v21 = vadd.f32 %v319_v14, %v263_v9  ;;  %v265_v22 = vld [vmem:[%s1993_s0 + $0xc0] sm:$0xff]  ;;  %v267_v23 = vld [vmem:[%s1993_s0 + $0xd0] sm:$0xff]  ;;  %v1216_v24 = vpack.c.bf16 %v376_v12, %v374_v11  ;;  %v378_v25 = vadd.f32 %v322_v17, %v266_v15 }
  0x18   : > { %v380_v26 = vadd.f32 %v324_v18, %v268_v16  ;;  %v321_v27 = vld [vmem:[%s1994_s1 + $0xc0] sm:$0xff]  ;;  %v323_v28 = vld [vmem:[%s1994_s1 + $0xd0] sm:$0xff]  ;;  %v270_v29 = vld [vmem:[%s1993_s0 + $0xe8] sm:$0xff] }
  0x19   : > { %1211 = vmatpush1.bf16.msra.mxu0 %v1210_v5  ;;  %1269 = vmatpush1.bf16.msra.mxu1 %v1210_v5  ;;  %v272_v30 = vld [vmem:[%s1993_s0 + $0xf8] sm:$0xff]  ;;  %v326_v31 = vld [vmem:[%s1994_s1 + $0xe8] sm:$0xff]  ;;  %v1218_v33 = vpack.c.bf16 %v375_v21, %v373_v20  ;;  %v377_v34 = vadd.f32 %v321_v27, %v265_v22  ;;  %v379_v35 = vadd.f32 %v323_v28, %v267_v23  ;;  %v269_v36 = vld [vmem:[%s1993_s0 + $0xe0] sm:$0xff] }
  0x1a   : > { %1213 = vmatprep.subr.bf16.mxu0 %v1212_v10  ;;  %1256 = vmatprep.subr.bf16.mxu1 %v1212_v10  ;;  %v328_v32 = vld [vmem:[%s1994_s1 + $0xf8] sm:$0xff]  ;;  %v271_v37 = vld [vmem:[%s1993_s0 + $0xf0] sm:$0xff]  ;;  %v1220_v38 = vpack.c.bf16 %v380_v26, %v378_v25  ;;  %v382_v39 = vadd.f32 %v326_v31, %v270_v29  ;;  %v325_v41 = vld [vmem:[%s1994_s1 + $0xe0] sm:$0xff] }
  0x1b   : > { %v384_v40 = vadd.f32 %v328_v32, %v272_v30  ;;  %v327_v42 = vld [vmem:[%s1994_s1 + $0xf0] sm:$0xff]  ;;  %v274_v43 = vld [vmem:[%s1993_s0 + $0x108] sm:$0xff]  ;;  %v276_v44 = vld [vmem:[%s1993_s0 + $0x118] sm:$0xff]  ;;  %v1222_v47 = vpack.c.bf16 %v379_v35, %v377_v34  ;;  %v381_v48 = vadd.f32 %v325_v41, %v269_v36 }
  0x1c   : > { %v330_v45 = vld [vmem:[%s1994_s1 + $0x108] sm:$0xff]  ;;  %v332_v46 = vld [vmem:[%s1994_s1 + $0x118] sm:$0xff]  ;;  %v383_v49 = vadd.f32 %v327_v42, %v271_v37  ;;  %v273_v50 = vld [vmem:[%s1993_s0 + $0x100] sm:$0xff] }
  0x1d   : > { %1215 = vmatpush1.bf16.msra.mxu0 %v1214_v19  ;;  %1270 = vmatpush1.bf16.msra.mxu1 %v1214_v19  ;;  %v275_v51 = vld [vmem:[%s1993_s0 + $0x110] sm:$0xff]  ;;  %v1224_v52 = vpack.c.bf16 %v384_v40, %v382_v39  ;;  %v386_v53 = vadd.f32 %v330_v45, %v274_v43  ;;  %v388_v54 = vadd.f32 %v332_v46, %v276_v44  ;;  %v329_v55 = vld [vmem:[%s1994_s1 + $0x100] sm:$0xff]  ;;  %v278_v57 = vld [vmem:[%s1993_s0 + $0x128] sm:$0xff] }
  0x1e   : > { %1217 = vmatprep.subr.bf16.mxu0 %v1216_v24  ;;  %1257 = vmatprep.subr.bf16.mxu1 %v1216_v24  ;;  %v331_v56 = vld [vmem:[%s1994_s1 + $0x110] sm:$0xff]  ;;  %v280_v58 = vld [vmem:[%s1993_s0 + $0x138] sm:$0xff]  ;;  %v334_v59 = vld [vmem:[%s1994_s1 + $0x128] sm:$0xff]  ;;  %v1226_v61 = vpack.c.bf16 %v383_v49, %v381_v48  ;;  %v385_v62 = vadd.f32 %v329_v55, %v273_v50 }
  0x1f   : > { %v336_v60 = vld [vmem:[%s1994_s1 + $0x138] sm:$0xff]  ;;  %v387_v63 = vadd.f32 %v331_v56, %v275_v51  ;;  %v277_v0 = vld [vmem:[%s1993_s0 + $0x120] sm:$0xff]  ;;  %v279_v1 = vld [vmem:[%s1993_s0 + $0x130] sm:$0xff]  ;;  %v1228_v2 = vpack.c.bf16 %v388_v54, %v386_v53  ;;  %v390_v3 = vadd.f32 %v334_v59, %v278_v57 }
  0x20   : > { %v392_v4 = vadd.f32 %v336_v60, %v280_v58  ;;  %v333_v5 = vld [vmem:[%s1994_s1 + $0x120] sm:$0xff]  ;;  %v335_v6 = vld [vmem:[%s1994_s1 + $0x130] sm:$0xff]  ;;  %v282_v7 = vld [vmem:[%s1993_s0 + $0x148] sm:$0xff] }
  0x21   : > { %1219 = vmatpush1.bf16.msra.mxu0 %v1218_v33  ;;  %1271 = vmatpush1.bf16.msra.mxu1 %v1218_v33  ;;  %v284_v8 = vld [vmem:[%s1993_s0 + $0x158] sm:$0xff]  ;;  %v338_v9 = vld [vmem:[%s1994_s1 + $0x148] sm:$0xff]  ;;  %v281_v11 = vld [vmem:[%s1993_s0 + $0x140] sm:$0xff]  ;;  %v1230_v12 = vpack.c.bf16 %v387_v63, %v385_v62  ;;  %v389_v13 = vadd.f32 %v333_v5, %v277_v0  ;;  %v391_v14 = vadd.f32 %v335_v6, %v279_v1 }
  0x22   : > { %1221 = vmatprep.subr.bf16.mxu0 %v1220_v38  ;;  %1258 = vmatprep.subr.bf16.mxu1 %v1220_v38  ;;  %v340_v10 = vld [vmem:[%s1994_s1 + $0x158] sm:$0xff]  ;;  %v283_v15 = vld [vmem:[%s1993_s0 + $0x150] sm:$0xff]  ;;  %v337_v16 = vld [vmem:[%s1994_s1 + $0x140] sm:$0xff]  ;;  %v1232_v18 = vpack.c.bf16 %v392_v4, %v390_v3  ;;  %v394_v19 = vadd.f32 %v338_v9, %v282_v7 }
  0x23   : > { %v339_v17 = vld [vmem:[%s1994_s1 + $0x150] sm:$0xff]  ;;  %v396_v20 = vadd.f32 %v340_v10, %v284_v8  ;;  %v286_v21 = vld [vmem:[%s1993_s0 + $0x168] sm:$0xff]  ;;  %v288_v22 = vld [vmem:[%s1993_s0 + $0x178] sm:$0xff]  ;;  %v1234_v27 = vpack.c.bf16 %v391_v14, %v389_v13  ;;  %v393_v28 = vadd.f32 %v337_v16, %v281_v11 }
  0x24   : > { %v342_v23 = vld [vmem:[%s1994_s1 + $0x168] sm:$0xff]  ;;  %v344_v24 = vld [vmem:[%s1994_s1 + $0x178] sm:$0xff]  ;;  %v395_v29 = vadd.f32 %v339_v17, %v283_v15  ;;  %v285_v30 = vld [vmem:[%s1993_s0 + $0x160] sm:$0xff] }
  0x25   : > { %1223 = vmatpush1.bf16.msra.mxu0 %v1222_v47  ;;  %1272 = vmatpush1.bf16.msra.mxu1 %v1222_v47  ;;  %v410_v25 = vld [vmem:[%s1642_s30 + $0x8] sm:$0xff]  ;;  %v452_v26 = vld [vmem:[%s1642_s30 + $0x158] sm:$0xff]  ;;  %v287_v31 = vld [vmem:[%s1993_s0 + $0x170] sm:$0xff]  ;;  %v1236_v32 = vpack.c.bf16 %v396_v20, %v394_v19  ;;  %v398_v33 = vadd.f32 %v342_v23, %v286_v21  ;;  %v400_v34 = vadd.f32 %v344_v24, %v288_v22 }
  0x26   : > { %1225 = vmatprep.subr.bf16.mxu0 %v1224_v52  ;;  %1259 = vmatprep.subr.bf16.mxu1 %v1224_v52  ;;  %v341_v35 = vld [vmem:[%s1994_s1 + $0x160] sm:$0xff]  ;;  %v343_v36 = vld [vmem:[%s1994_s1 + $0x170] sm:$0xff]  ;;  %v290_v37 = vld [vmem:[%s1993_s0 + $0x188] sm:$0xff]  ;;  %v1238_v41 = vpack.c.bf16 %v395_v29, %v393_v28 }
  0x27   : > { %1150 = vmatprep.mubr.msk.f32.mxu0 %vm493_vm0, %v410_v25  ;;  %1171 = vmatprep.mubr.msk.f32.mxu1 %vm493_vm0, %v452_v26  ;;  %v292_v38 = vld [vmem:[%s1993_s0 + $0x198] sm:$0xff]  ;;  %v346_v39 = vld [vmem:[%s1994_s1 + $0x188] sm:$0xff]  ;;  %v397_v42 = vadd.f32 %v341_v35, %v285_v30  ;;  %v399_v43 = vadd.f32 %v343_v36, %v287_v31  ;;  %v289_v44 = vld [vmem:[%s1993_s0 + $0x180] sm:$0xff]  ;;  %v1240_v46 = vpack.c.bf16 %v400_v34, %v398_v33 }
  0x28   : > { %v348_v40 = vld [vmem:[%s1994_s1 + $0x198] sm:$0xff]  ;;  %v291_v45 = vld [vmem:[%s1993_s0 + $0x190] sm:$0xff]  ;;  %v402_v47 = vadd.f32 %v346_v39, %v290_v37  ;;  %v345_v49 = vld [vmem:[%s1994_s1 + $0x180] sm:$0xff] }
  0x29   : > { %1227 = vmatpush1.bf16.msra.mxu0 %v1226_v61  ;;  %1273 = vmatpush1.bf16.msra.mxu1 %v1226_v61  ;;  %v404_v48 = vadd.f32 %v348_v40, %v292_v38  ;;  %v347_v50 = vld [vmem:[%s1994_s1 + $0x190] sm:$0xff]  ;;  %v294_v51 = vld [vmem:[%s1993_s0 + $0x1a8] sm:$0xff]  ;;  %v296_v52 = vld [vmem:[%s1993_s0 + $0x1b8] sm:$0xff]  ;;  %v1242_v55 = vpack.c.bf16 %v399_v43, %v397_v42  ;;  %v401_v56 = vadd.f32 %v345_v49, %v289_v44 }
  0x2a   : > { %1229 = vmatprep.subr.bf16.mxu0 %v1228_v2  ;;  %1260 = vmatprep.subr.bf16.mxu1 %v1228_v2  ;;  %v350_v53 = vld [vmem:[%s1994_s1 + $0x1a8] sm:$0xff]  ;;  %v352_v54 = vld [vmem:[%s1994_s1 + $0x1b8] sm:$0xff]  ;;  %v403_v57 = vadd.f32 %v347_v50, %v291_v45  ;;  %v293_v58 = vld [vmem:[%s1993_s0 + $0x1a0] sm:$0xff] }
  0x2b   : > { %v1244_v59 = vpack.c.bf16 %v404_v48, %v402_v47  ;;  %v406_v60 = vadd.f32 %v350_v53, %v294_v51  ;;  %v408_v61 = vadd.f32 %v352_v54, %v296_v52  ;;  %v295_v62 = vld [vmem:[%s1993_s0 + $0x1b0] sm:$0xff]  ;;  %v349_v63 = vld [vmem:[%s1994_s1 + $0x1a0] sm:$0xff]  ;;  %v412_v8 = vld [vmem:[%s1642_s30 + $0x18] sm:$0xff] }
  0x2c   : > { %v351_v0 = vld [vmem:[%s1994_s1 + $0x1b0] sm:$0xff]  ;;  %v1246_v1 = vpack.c.bf16 %v403_v57, %v401_v56  ;;  %v405_v2 = vadd.f32 %v349_v63, %v293_v58  ;;  %v409_v6 = vld [vmem:[%s1642_s30] sm:$0xff]  ;;  %v454_v9 = vld [vmem:[%s1642_s30 + $0x168] sm:$0xff] }
  0x2d   : > { %1231 = vmatpush1.bf16.msra.mxu0 %v1230_v12  ;;  %1274 = vmatpush1.bf16.msra.mxu1 %v1230_v12  ;;  %v407_v3 = vadd.f32 %v351_v0, %v295_v62  ;;  %v1248_v4 = vpack.c.bf16 %v408_v61, %v406_v60  ;;  %v451_v7 = vld [vmem:[%s1642_s30 + $0x150] sm:$0xff]  ;;  %v453_v11 = vld [vmem:[%s1642_s30 + $0x160] sm:$0xff]  ;;  %v414_v12 = vld [vmem:[%s1642_s30 + $0x28] sm:$0xff] }
  0x2e   : > { %1233 = vmatprep.subr.bf16.mxu0 %v1232_v18  ;;  %1261 = vmatprep.subr.bf16.mxu1 %v1232_v18  ;;  %v411_v10 = vld [vmem:[%s1642_s30 + $0x10] sm:$0xff]  ;;  %v456_v13 = vld [vmem:[%s1642_s30 + $0x178] sm:$0xff]  ;;  %v413_v14 = vld [vmem:[%s1642_s30 + $0x20] sm:$0xff] }
  0x2f   : > { %v1250_v5 = vpack.c.bf16 %v407_v3, %v405_v2  ;;  %v455_v15 = vld [vmem:[%s1642_s30 + $0x170] sm:$0xff]  ;;  %v416_v16 = vld [vmem:[%s1642_s30 + $0x38] sm:$0xff]  ;;  %v458_v17 = vld [vmem:[%s1642_s30 + $0x188] sm:$0xff] }
  0x30   : > { %v415_v18 = vld [vmem:[%s1642_s30 + $0x30] sm:$0xff]  ;;  %v457_v19 = vld [vmem:[%s1642_s30 + $0x180] sm:$0xff]  ;;  %v418_v20 = vld [vmem:[%s1642_s30 + $0x48] sm:$0xff] }
  0x31   : > { %1235 = vmatpush1.bf16.msra.mxu0 %v1234_v27  ;;  %1275 = vmatpush1.bf16.msra.mxu1 %v1234_v27  ;;  %v460_v21 = vld [vmem:[%s1642_s30 + $0x198] sm:$0xff]  ;;  %v417_v22 = vld [vmem:[%s1642_s30 + $0x40] sm:$0xff]  ;;  %v459_v23 = vld [vmem:[%s1642_s30 + $0x190] sm:$0xff] }
  0x32   : > { %1237 = vmatprep.subr.bf16.mxu0 %v1236_v32  ;;  %1262 = vmatprep.subr.bf16.mxu1 %v1236_v32  ;;  %v420_v24 = vld [vmem:[%s1642_s30 + $0x58] sm:$0xff]  ;;  %v462_v25 = vld [vmem:[%s1642_s30 + $0x1a8] sm:$0xff]  ;;  %v419_v26 = vld [vmem:[%s1642_s30 + $0x50] sm:$0xff] }
  0x33   : > { %v461_v27 = vld [vmem:[%s1642_s30 + $0x1a0] sm:$0xff]  ;;  %v422_v28 = vld [vmem:[%s1642_s30 + $0x68] sm:$0xff]  ;;  %v464_v29 = vld [vmem:[%s1642_s30 + $0x1b8] sm:$0xff] }
  0x34   : > { %v421_v30 = vld [vmem:[%s1642_s30 + $0x60] sm:$0xff]  ;;  %v463_v31 = vld [vmem:[%s1642_s30 + $0x1b0] sm:$0xff]  ;;  %v424_v32 = vld [vmem:[%s1642_s30 + $0x78] sm:$0xff] }
  0x35   : > { %1239 = vmatpush1.bf16.msra.mxu0 %v1238_v41  ;;  %1276 = vmatpush1.bf16.msra.mxu1 %v1238_v41  ;;  %v466_v33 = vld [vmem:[%s1642_s30 + $0x1c8] sm:$0xff]  ;;  %v423_v34 = vld [vmem:[%s1642_s30 + $0x70] sm:$0xff]  ;;  %v465_v35 = vld [vmem:[%s1642_s30 + $0x1c0] sm:$0xff] }
  0x36   : > { %1241 = vmatprep.subr.bf16.mxu0 %v1240_v46  ;;  %1263 = vmatprep.subr.bf16.mxu1 %v1240_v46  ;;  %v426_v36 = vld [vmem:[%s1642_s30 + $0x88] sm:$0xff]  ;;  %v468_v37 = vld [vmem:[%s1642_s30 + $0x1d8] sm:$0xff]  ;;  %v425_v38 = vld [vmem:[%s1642_s30 + $0x80] sm:$0xff] }
  0x37   : > { %v467_v39 = vld [vmem:[%s1642_s30 + $0x1d0] sm:$0xff]  ;;  %v428_v40 = vld [vmem:[%s1642_s30 + $0x98] sm:$0xff]  ;;  %v470_v41 = vld [vmem:[%s1642_s30 + $0x1e8] sm:$0xff] }
  0x38   : > { %v427_v42 = vld [vmem:[%s1642_s30 + $0x90] sm:$0xff]  ;;  %v469_v43 = vld [vmem:[%s1642_s30 + $0x1e0] sm:$0xff]  ;;  %v430_v44 = vld [vmem:[%s1642_s30 + $0xa8] sm:$0xff] }
  0x39   : > { %1243 = vmatpush1.bf16.msra.mxu0 %v1242_v55  ;;  %1277 = vmatpush1.bf16.msra.mxu1 %v1242_v55  ;;  %v472_v45 = vld [vmem:[%s1642_s30 + $0x1f8] sm:$0xff]  ;;  %v429_v46 = vld [vmem:[%s1642_s30 + $0xa0] sm:$0xff]  ;;  %v471_v47 = vld [vmem:[%s1642_s30 + $0x1f0] sm:$0xff] }
  0x3a   : > { %1245 = vmatprep.subr.bf16.mxu0 %v1244_v59  ;;  %1264 = vmatprep.subr.bf16.mxu1 %v1244_v59  ;;  %v432_v48 = vld [vmem:[%s1642_s30 + $0xb8] sm:$0xff]  ;;  %v474_v49 = vld [vmem:[%s1642_s30 + $0x208] sm:$0xff]  ;;  %v431_v50 = vld [vmem:[%s1642_s30 + $0xb0] sm:$0xff] }
  0x3b   : > { %v473_v51 = vld [vmem:[%s1642_s30 + $0x200] sm:$0xff]  ;;  %v434_v52 = vld [vmem:[%s1642_s30 + $0xc8] sm:$0xff]  ;;  %v476_v53 = vld [vmem:[%s1642_s30 + $0x218] sm:$0xff] }
  0x3c   : > { %v433_v54 = vld [vmem:[%s1642_s30 + $0xc0] sm:$0xff]  ;;  %v475_v55 = vld [vmem:[%s1642_s30 + $0x210] sm:$0xff]  ;;  %v436_v56 = vld [vmem:[%s1642_s30 + $0xd8] sm:$0xff] }
  0x3d   : > { %1247 = vmatpush1.bf16.msra.mxu0 %v1246_v1  ;;  %1278 = vmatpush1.bf16.msra.mxu1 %v1246_v1  ;;  %v478_v57 = vld [vmem:[%s1642_s30 + $0x228] sm:$0xff]  ;;  %v435_v58 = vld [vmem:[%s1642_s30 + $0xd0] sm:$0xff]  ;;  %v477_v59 = vld [vmem:[%s1642_s30 + $0x220] sm:$0xff] }
  0x3e   : > { %1249 = vmatprep.subr.bf16.mxu0 %v1248_v4  ;;  %1265 = vmatprep.subr.bf16.mxu1 %v1248_v4  ;;  %v438_v60 = vld [vmem:[%s1642_s30 + $0xe8] sm:$0xff]  ;;  %v480_v61 = vld [vmem:[%s1642_s30 + $0x238] sm:$0xff]  ;;  %v437_v62 = vld [vmem:[%s1642_s30 + $0xe0] sm:$0xff] }
  0x3f   : > { %v479_v63 = vld [vmem:[%s1642_s30 + $0x230] sm:$0xff]  ;;  %v440_v0 = vld [vmem:[%s1642_s30 + $0xf8] sm:$0xff]  ;;  %v482_v1 = vld [vmem:[%s1642_s30 + $0x248] sm:$0xff] }
  0x40   : > { %v439_v2 = vld [vmem:[%s1642_s30 + $0xf0] sm:$0xff]  ;;  %v481_v3 = vld [vmem:[%s1642_s30 + $0x240] sm:$0xff]  ;;  %v442_v4 = vld [vmem:[%s1642_s30 + $0x108] sm:$0xff] }
  0x41   : > { %1251 = vmatpush1.bf16.msra.mxu0 %v1250_v5  ;;  %1279 = vmatpush1.bf16.msra.mxu1 %v1250_v5  ;;  %v484_v5 = vld [vmem:[%s1642_s30 + $0x258] sm:$0xff] }
  0x44   : > { %685 = vmatmul.mubr.f32.vlgmr.msra.gmra.mrb[0].mxu0 %v409_v6  ;;  %811 = vmatmul.mubr.f32.vlgmr.msra.gmra.mrb[0].mxu1 %v451_v7  ;;  %v441_v6 = vld [vmem:[%s1642_s30 + $0x100] sm:$0xff]  ;;  %v483_v7 = vld [vmem:[%s1642_s30 + $0x250] sm:$0xff] }
  0x45   : > { %1151 = vmatprep.mubr.msk.f32.mxu0 %vm493_vm0, %v412_v8  ;;  %1172 = vmatprep.mubr.msk.f32.mxu1 %vm493_vm0, %v454_v9  ;;  %v444_v8 = vld [vmem:[%s1642_s30 + $0x118] sm:$0xff]  ;;  %v486_v9 = vld [vmem:[%s1642_s30 + $0x268] sm:$0xff] }
  0x48   : > { %691 = vmatmul.mubr.f32.gmra.mrb[2].mxu0 %v411_v10  ;;  %817 = vmatmul.mubr.f32.gmra.mrb[2].mxu1 %v453_v11  ;;  %v443_v10 = vld [vmem:[%s1642_s30 + $0x110] sm:$0xff]  ;;  %v485_v11 = vld [vmem:[%s1642_s30 + $0x260] sm:$0xff] }
  0x49   : > { %1152 = vmatprep.mubr.msk.f32.mxu0 %vm493_vm0, %v414_v12  ;;  %1173 = vmatprep.mubr.msk.f32.mxu1 %vm493_vm0, %v456_v13  ;;  %v446_v12 = vld [vmem:[%s1642_s30 + $0x128] sm:$0xff]  ;;  %v488_v13 = vld [vmem:[%s1642_s30 + $0x278] sm:$0xff] }
  0x4c   : > { %697 = vmatmul.mubr.f32.gmra.mrb[4].mxu0 %v413_v14  ;;  %823 = vmatmul.mubr.f32.gmra.mrb[4].mxu1 %v455_v15  ;;  %v445_v14 = vld [vmem:[%s1642_s30 + $0x120] sm:$0xff]  ;;  %v487_v15 = vld [vmem:[%s1642_s30 + $0x270] sm:$0xff] }
  0x4d   : > { %1153 = vmatprep.mubr.msk.f32.mxu0 %vm493_vm0, %v416_v16  ;;  %1174 = vmatprep.mubr.msk.f32.mxu1 %vm493_vm0, %v458_v17  ;;  %v448_v16 = vld [vmem:[%s1642_s30 + $0x138] sm:$0xff]  ;;  %v490_v17 = vld [vmem:[%s1642_s30 + $0x288] sm:$0xff] }
  0x50   : > { %703 = vmatmul.mubr.f32.gmra.mrb[6].mxu0 %v415_v18  ;;  %829 = vmatmul.mubr.f32.gmra.mrb[6].mxu1 %v457_v19  ;;  %v447_v18 = vld [vmem:[%s1642_s30 + $0x130] sm:$0xff]  ;;  %v489_v19 = vld [vmem:[%s1642_s30 + $0x280] sm:$0xff] }
  0x51   : > { %1154 = vmatprep.mubr.msk.f32.mxu0 %vm493_vm0, %v418_v20  ;;  %1175 = vmatprep.mubr.msk.f32.mxu1 %vm493_vm0, %v460_v21  ;;  %v450_v20 = vld [vmem:[%s1642_s30 + $0x148] sm:$0xff]  ;;  %v492_v21 = vld [vmem:[%s1642_s30 + $0x298] sm:$0xff] }
  0x54   : > { %709 = vmatmul.mubr.f32.gmra.mrb[8].mxu0 %v417_v22  ;;  %835 = vmatmul.mubr.f32.gmra.mrb[8].mxu1 %v459_v23  ;;  %v449_v22 = vld [vmem:[%s1642_s30 + $0x140] sm:$0xff]  ;;  %v491_v23 = vld [vmem:[%s1642_s30 + $0x290] sm:$0xff] }
  0x55   : > { %1155 = vmatprep.mubr.msk.f32.mxu0 %vm493_vm0, %v420_v24  ;;  %1176 = vmatprep.mubr.msk.f32.mxu1 %vm493_vm0, %v462_v25 }
  0x58   : > { %715 = vmatmul.mubr.f32.gmra.mrb[10].mxu0 %v419_v26  ;;  %841 = vmatmul.mubr.f32.gmra.mrb[10].mxu1 %v461_v27 }
  0x59   : > { %1156 = vmatprep.mubr.msk.f32.mxu0 %vm493_vm0, %v422_v28  ;;  %1177 = vmatprep.mubr.msk.f32.mxu1 %vm493_vm0, %v464_v29 }
  0x5c   : > { %721 = vmatmul.mubr.f32.gmra.mrb[12].mxu0 %v421_v30  ;;  %847 = vmatmul.mubr.f32.gmra.mrb[12].mxu1 %v463_v31 }
  0x5d   : > { %1157 = vmatprep.mubr.msk.f32.mxu0 %vm493_vm0, %v424_v32  ;;  %1178 = vmatprep.mubr.msk.f32.mxu1 %vm493_vm0, %v466_v33 }
  0x60   : > { %727 = vmatmul.mubr.f32.gmra.mrb[14].mxu0 %v423_v34  ;;  %853 = vmatmul.mubr.f32.gmra.mrb[14].mxu1 %v465_v35 }
  0x61   : > { %1158 = vmatprep.mubr.msk.f32.mxu0 %vm493_vm0, %v426_v36  ;;  %1179 = vmatprep.mubr.msk.f32.mxu1 %vm493_vm0, %v468_v37 }
  0x64   : > { %733 = vmatmul.mubr.f32.gmra.mrb[16].mxu0 %v425_v38  ;;  %859 = vmatmul.mubr.f32.gmra.mrb[16].mxu1 %v467_v39 }
  0x65   : > { %1159 = vmatprep.mubr.msk.f32.mxu0 %vm493_vm0, %v428_v40  ;;  %1180 = vmatprep.mubr.msk.f32.mxu1 %vm493_vm0, %v470_v41 }
  0x68   : > { %739 = vmatmul.mubr.f32.gmra.mrb[18].mxu0 %v427_v42  ;;  %865 = vmatmul.mubr.f32.gmra.mrb[18].mxu1 %v469_v43 }
  0x69   : > { %1160 = vmatprep.mubr.msk.f32.mxu0 %vm493_vm0, %v430_v44  ;;  %1181 = vmatprep.mubr.msk.f32.mxu1 %vm493_vm0, %v472_v45 }
  0x6c   : > { %745 = vmatmul.mubr.f32.gmra.mrb[20].mxu0 %v429_v46  ;;  %871 = vmatmul.mubr.f32.gmra.mrb[20].mxu1 %v471_v47 }
  0x6d   : > { %1161 = vmatprep.mubr.msk.f32.mxu0 %vm493_vm0, %v432_v48  ;;  %1182 = vmatprep.mubr.msk.f32.mxu1 %vm493_vm0, %v474_v49 }
  0x70   : > { %751 = vmatmul.mubr.f32.gmra.mrb[22].mxu0 %v431_v50  ;;  %877 = vmatmul.mubr.f32.gmra.mrb[22].mxu1 %v473_v51 }
  0x71   : > { %1162 = vmatprep.mubr.msk.f32.mxu0 %vm493_vm0, %v434_v52  ;;  %1183 = vmatprep.mubr.msk.f32.mxu1 %vm493_vm0, %v476_v53 }
  0x74   : > { %757 = vmatmul.mubr.f32.gmra.mrb[24].mxu0 %v433_v54  ;;  %883 = vmatmul.mubr.f32.gmra.mrb[24].mxu1 %v475_v55 }
  0x75   : > { %1163 = vmatprep.mubr.msk.f32.mxu0 %vm493_vm0, %v436_v56  ;;  %1184 = vmatprep.mubr.msk.f32.mxu1 %vm493_vm0, %v478_v57 }
  0x78   : > { %763 = vmatmul.mubr.f32.gmra.mrb[26].mxu0 %v435_v58  ;;  %889 = vmatmul.mubr.f32.gmra.mrb[26].mxu1 %v477_v59 }
  0x79   : > { %1164 = vmatprep.mubr.msk.f32.mxu0 %vm493_vm0, %v438_v60  ;;  %1185 = vmatprep.mubr.msk.f32.mxu1 %vm493_vm0, %v480_v61 }
  0x7c   : > { %769 = vmatmul.mubr.f32.gmra.mrb[28].mxu0 %v437_v62  ;;  %895 = vmatmul.mubr.f32.gmra.mrb[28].mxu1 %v479_v63 }
  0x7d   : > { %1165 = vmatprep.mubr.msk.f32.mxu0 %vm493_vm0, %v440_v0  ;;  %1186 = vmatprep.mubr.msk.f32.mxu1 %vm493_vm0, %v482_v1 }
  0x80   : > { %775 = vmatmul.mubr.f32.gmra.mrb[30].mxu0 %v439_v2  ;;  %901 = vmatmul.mubr.f32.gmra.mrb[30].mxu1 %v481_v3 }
  0x81   : > { %1166 = vmatprep.mubr.msk.f32.mxu0 %vm493_vm0, %v442_v4  ;;  %1187 = vmatprep.mubr.msk.f32.mxu1 %vm493_vm0, %v484_v5 }
  0x84   : > { %781 = vmatmul.mubr.f32.gmra.mrb[32].mxu0 %v441_v6  ;;  %907 = vmatmul.mubr.f32.gmra.mrb[32].mxu1 %v483_v7 }
  0x85   : > { %1167 = vmatprep.mubr.msk.f32.mxu0 %vm493_vm0, %v444_v8  ;;  %1188 = vmatprep.mubr.msk.f32.mxu1 %vm493_vm0, %v486_v9 }
  0x88   : > { %787 = vmatmul.mubr.f32.gmra.mrb[34].mxu0 %v443_v10  ;;  %913 = vmatmul.mubr.f32.gmra.mrb[34].mxu1 %v485_v11 }
  0x89   : > { %1168 = vmatprep.mubr.msk.f32.mxu0 %vm493_vm0, %v446_v12  ;;  %1189 = vmatprep.mubr.msk.f32.mxu1 %vm493_vm0, %v488_v13 }
  0x8c   : > { %793 = vmatmul.mubr.f32.gmra.mrb[36].mxu0 %v445_v14  ;;  %919 = vmatmul.mubr.f32.gmra.mrb[36].mxu1 %v487_v15 }
  0x8d   : > { %1169 = vmatprep.mubr.msk.f32.mxu0 %vm493_vm0, %v448_v16  ;;  %1190 = vmatprep.mubr.msk.f32.mxu1 %vm493_vm0, %v490_v17 }
  0x90   : > { %799 = vmatmul.mubr.f32.gmra.mrb[38].mxu0 %v447_v18  ;;  %925 = vmatmul.mubr.f32.gmra.mrb[38].mxu1 %v489_v19 }
  0x91   : > { %1170 = vmatprep.mubr.msk.f32.mxu0 %vm493_vm0, %v450_v20  ;;  %1191 = vmatprep.mubr.msk.f32.mxu1 %vm493_vm0, %v492_v21 }
  0x94   : > { %805 = vmatmul.mubr.f32.gmra.mrb[40].mxu0 %v449_v22  ;;  %931 = vmatmul.mubr.f32.gmra.mrb[40].mxu1 %v491_v23 }
 0x117   : > { %v686_v24 = vpop.f32.mrb[0].mxu0  ;;  %v812_v25 = vpop.f32.mrb[0].mxu1 }
 0x118   : > { %937 = vst [vmem:[%s1856_s24] sm:$0xff] %v686_v24  ;;  %980 = vst [vmem:[%s1856_s24 + $0x150] sm:$0xff] %v812_v25  ;;  %v688_v26 = vpop.f32.mrb[1].mxu0  ;;  %v814_v27 = vpop.f32.mrb[1].mxu1 }
 0x119   : > { %939 = vst.msk [vmem:[%s1856_s24 + $0x8] sm:$0xff] %vm938_vm1, %v688_v26  ;;  %981 = vst.msk [vmem:[%s1856_s24 + $0x158] sm:$0xff] %vm938_vm1, %v814_v27 }
 0x11b   : > { %v692_v28 = vpop.f32.mrb[2].mxu0  ;;  %v818_v29 = vpop.f32.mrb[2].mxu1 }
 0x11c   : > { %940 = vst [vmem:[%s1856_s24 + $0x10] sm:$0xff] %v692_v28  ;;  %982 = vst [vmem:[%s1856_s24 + $0x160] sm:$0xff] %v818_v29  ;;  %v694_v30 = vpop.f32.mrb[3].mxu0  ;;  %v820_v31 = vpop.f32.mrb[3].mxu1 }
 0x11d   : > { %941 = vst.msk [vmem:[%s1856_s24 + $0x18] sm:$0xff] %vm938_vm1, %v694_v30  ;;  %983 = vst.msk [vmem:[%s1856_s24 + $0x168] sm:$0xff] %vm938_vm1, %v820_v31 }
 0x11f   : > { %v698_v32 = vpop.f32.mrb[4].mxu0  ;;  %v824_v33 = vpop.f32.mrb[4].mxu1 }
 0x120   : > { %942 = vst [vmem:[%s1856_s24 + $0x20] sm:$0xff] %v698_v32  ;;  %984 = vst [vmem:[%s1856_s24 + $0x170] sm:$0xff] %v824_v33  ;;  %v700_v34 = vpop.f32.mrb[5].mxu0  ;;  %v826_v35 = vpop.f32.mrb[5].mxu1 }
 0x121   : > { %943 = vst.msk [vmem:[%s1856_s24 + $0x28] sm:$0xff] %vm938_vm1, %v700_v34  ;;  %985 = vst.msk [vmem:[%s1856_s24 + $0x178] sm:$0xff] %vm938_vm1, %v826_v35 }
 0x123   : > { %v704_v36 = vpop.f32.mrb[6].mxu0  ;;  %v830_v37 = vpop.f32.mrb[6].mxu1 }
 0x124   : > { %944 = vst [vmem:[%s1856_s24 + $0x30] sm:$0xff] %v704_v36  ;;  %986 = vst [vmem:[%s1856_s24 + $0x180] sm:$0xff] %v830_v37  ;;  %v706_v38 = vpop.f32.mrb[7].mxu0  ;;  %v832_v39 = vpop.f32.mrb[7].mxu1 }
 0x125   : > { %945 = vst.msk [vmem:[%s1856_s24 + $0x38] sm:$0xff] %vm938_vm1, %v706_v38  ;;  %987 = vst.msk [vmem:[%s1856_s24 + $0x188] sm:$0xff] %vm938_vm1, %v832_v39 }
 0x127   : > { %v710_v40 = vpop.f32.mrb[8].mxu0  ;;  %v836_v41 = vpop.f32.mrb[8].mxu1 }
 0x128   : > { %946 = vst [vmem:[%s1856_s24 + $0x40] sm:$0xff] %v710_v40  ;;  %988 = vst [vmem:[%s1856_s24 + $0x190] sm:$0xff] %v836_v41  ;;  %v712_v42 = vpop.f32.mrb[9].mxu0  ;;  %v838_v43 = vpop.f32.mrb[9].mxu1 }
 0x129   : > { %947 = vst.msk [vmem:[%s1856_s24 + $0x48] sm:$0xff] %vm938_vm1, %v712_v42  ;;  %989 = vst.msk [vmem:[%s1856_s24 + $0x198] sm:$0xff] %vm938_vm1, %v838_v43 }
 0x12b   : > { %v716_v44 = vpop.f32.mrb[10].mxu0  ;;  %v842_v45 = vpop.f32.mrb[10].mxu1 }
 0x12c   : > { %948 = vst [vmem:[%s1856_s24 + $0x50] sm:$0xff] %v716_v44  ;;  %990 = vst [vmem:[%s1856_s24 + $0x1a0] sm:$0xff] %v842_v45  ;;  %v718_v46 = vpop.f32.mrb[11].mxu0  ;;  %v844_v47 = vpop.f32.mrb[11].mxu1 }
 0x12d   : > { %949 = vst.msk [vmem:[%s1856_s24 + $0x58] sm:$0xff] %vm938_vm1, %v718_v46  ;;  %991 = vst.msk [vmem:[%s1856_s24 + $0x1a8] sm:$0xff] %vm938_vm1, %v844_v47 }
 0x12f   : > { %v722_v48 = vpop.f32.mrb[12].mxu0  ;;  %v848_v49 = vpop.f32.mrb[12].mxu1 }
 0x130   : > { %950 = vst [vmem:[%s1856_s24 + $0x60] sm:$0xff] %v722_v48  ;;  %992 = vst [vmem:[%s1856_s24 + $0x1b0] sm:$0xff] %v848_v49  ;;  %v724_v50 = vpop.f32.mrb[13].mxu0  ;;  %v850_v51 = vpop.f32.mrb[13].mxu1 }
 0x131   : > { %951 = vst.msk [vmem:[%s1856_s24 + $0x68] sm:$0xff] %vm938_vm1, %v724_v50  ;;  %993 = vst.msk [vmem:[%s1856_s24 + $0x1b8] sm:$0xff] %vm938_vm1, %v850_v51 }
 0x133   : > { %v728_v52 = vpop.f32.mrb[14].mxu0  ;;  %v854_v53 = vpop.f32.mrb[14].mxu1 }
 0x134   : > { %952 = vst [vmem:[%s1856_s24 + $0x70] sm:$0xff] %v728_v52  ;;  %994 = vst [vmem:[%s1856_s24 + $0x1c0] sm:$0xff] %v854_v53  ;;  %v730_v54 = vpop.f32.mrb[15].mxu0  ;;  %v856_v55 = vpop.f32.mrb[15].mxu1 }
 0x135   : > { %953 = vst.msk [vmem:[%s1856_s24 + $0x78] sm:$0xff] %vm938_vm1, %v730_v54  ;;  %995 = vst.msk [vmem:[%s1856_s24 + $0x1c8] sm:$0xff] %vm938_vm1, %v856_v55 }
 0x137   : > { %v734_v56 = vpop.f32.mrb[16].mxu0  ;;  %v860_v57 = vpop.f32.mrb[16].mxu1 }
 0x138   : > { %954 = vst [vmem:[%s1856_s24 + $0x80] sm:$0xff] %v734_v56  ;;  %996 = vst [vmem:[%s1856_s24 + $0x1d0] sm:$0xff] %v860_v57  ;;  %v736_v58 = vpop.f32.mrb[17].mxu0  ;;  %v862_v59 = vpop.f32.mrb[17].mxu1 }
 0x139   : > { %955 = vst.msk [vmem:[%s1856_s24 + $0x88] sm:$0xff] %vm938_vm1, %v736_v58  ;;  %997 = vst.msk [vmem:[%s1856_s24 + $0x1d8] sm:$0xff] %vm938_vm1, %v862_v59 }
 0x13b   : > { %v740_v60 = vpop.f32.mrb[18].mxu0  ;;  %v866_v61 = vpop.f32.mrb[18].mxu1 }
 0x13c   : > { %956 = vst [vmem:[%s1856_s24 + $0x90] sm:$0xff] %v740_v60  ;;  %998 = vst [vmem:[%s1856_s24 + $0x1e0] sm:$0xff] %v866_v61  ;;  %v742_v62 = vpop.f32.mrb[19].mxu0  ;;  %v868_v63 = vpop.f32.mrb[19].mxu1 }
 0x13d   : > { %957 = vst.msk [vmem:[%s1856_s24 + $0x98] sm:$0xff] %vm938_vm1, %v742_v62  ;;  %999 = vst.msk [vmem:[%s1856_s24 + $0x1e8] sm:$0xff] %vm938_vm1, %v868_v63 }
 0x13f   : > { %v746_v0 = vpop.f32.mrb[20].mxu0  ;;  %v872_v1 = vpop.f32.mrb[20].mxu1 }
 0x140   : > { %958 = vst [vmem:[%s1856_s24 + $0xa0] sm:$0xff] %v746_v0  ;;  %1000 = vst [vmem:[%s1856_s24 + $0x1f0] sm:$0xff] %v872_v1  ;;  %v748_v2 = vpop.f32.mrb[21].mxu0  ;;  %v874_v3 = vpop.f32.mrb[21].mxu1 }
 0x141   : > { %959 = vst.msk [vmem:[%s1856_s24 + $0xa8] sm:$0xff] %vm938_vm1, %v748_v2  ;;  %1001 = vst.msk [vmem:[%s1856_s24 + $0x1f8] sm:$0xff] %vm938_vm1, %v874_v3 }
 0x143   : > { %v752_v4 = vpop.f32.mrb[22].mxu0  ;;  %v878_v5 = vpop.f32.mrb[22].mxu1 }
 0x144   : > { %960 = vst [vmem:[%s1856_s24 + $0xb0] sm:$0xff] %v752_v4  ;;  %1002 = vst [vmem:[%s1856_s24 + $0x200] sm:$0xff] %v878_v5  ;;  %v754_v6 = vpop.f32.mrb[23].mxu0  ;;  %v880_v7 = vpop.f32.mrb[23].mxu1 }
 0x145   : > { %961 = vst.msk [vmem:[%s1856_s24 + $0xb8] sm:$0xff] %vm938_vm1, %v754_v6  ;;  %1003 = vst.msk [vmem:[%s1856_s24 + $0x208] sm:$0xff] %vm938_vm1, %v880_v7 }
 0x147   : > { %v758_v8 = vpop.f32.mrb[24].mxu0  ;;  %v884_v9 = vpop.f32.mrb[24].mxu1 }
 0x148   : > { %962 = vst [vmem:[%s1856_s24 + $0xc0] sm:$0xff] %v758_v8  ;;  %1004 = vst [vmem:[%s1856_s24 + $0x210] sm:$0xff] %v884_v9  ;;  %v760_v10 = vpop.f32.mrb[25].mxu0  ;;  %v886_v11 = vpop.f32.mrb[25].mxu1 }
 0x149   : > { %963 = vst.msk [vmem:[%s1856_s24 + $0xc8] sm:$0xff] %vm938_vm1, %v760_v10  ;;  %1005 = vst.msk [vmem:[%s1856_s24 + $0x218] sm:$0xff] %vm938_vm1, %v886_v11 }
 0x14b   : > { %v764_v12 = vpop.f32.mrb[26].mxu0  ;;  %v890_v13 = vpop.f32.mrb[26].mxu1 }
 0x14c   : > { %964 = vst [vmem:[%s1856_s24 + $0xd0] sm:$0xff] %v764_v12  ;;  %1006 = vst [vmem:[%s1856_s24 + $0x220] sm:$0xff] %v890_v13  ;;  %v766_v14 = vpop.f32.mrb[27].mxu0  ;;  %v892_v15 = vpop.f32.mrb[27].mxu1 }
 0x14d   : > { %965 = vst.msk [vmem:[%s1856_s24 + $0xd8] sm:$0xff] %vm938_vm1, %v766_v14  ;;  %1007 = vst.msk [vmem:[%s1856_s24 + $0x228] sm:$0xff] %vm938_vm1, %v892_v15 }
 0x14f   : > { %v770_v16 = vpop.f32.mrb[28].mxu0  ;;  %v896_v17 = vpop.f32.mrb[28].mxu1 }
 0x150   : > { %966 = vst [vmem:[%s1856_s24 + $0xe0] sm:$0xff] %v770_v16  ;;  %1008 = vst [vmem:[%s1856_s24 + $0x230] sm:$0xff] %v896_v17  ;;  %v772_v18 = vpop.f32.mrb[29].mxu0  ;;  %v898_v19 = vpop.f32.mrb[29].mxu1 }
 0x151   : > { %967 = vst.msk [vmem:[%s1856_s24 + $0xe8] sm:$0xff] %vm938_vm1, %v772_v18  ;;  %1009 = vst.msk [vmem:[%s1856_s24 + $0x238] sm:$0xff] %vm938_vm1, %v898_v19 }
 0x153   : > { %v776_v20 = vpop.f32.mrb[30].mxu0  ;;  %v902_v21 = vpop.f32.mrb[30].mxu1 }
 0x154   : > { %968 = vst [vmem:[%s1856_s24 + $0xf0] sm:$0xff] %v776_v20  ;;  %1010 = vst [vmem:[%s1856_s24 + $0x240] sm:$0xff] %v902_v21  ;;  %v778_v22 = vpop.f32.mrb[31].mxu0  ;;  %v904_v23 = vpop.f32.mrb[31].mxu1 }
 0x155   : > { %969 = vst.msk [vmem:[%s1856_s24 + $0xf8] sm:$0xff] %vm938_vm1, %v778_v22  ;;  %1011 = vst.msk [vmem:[%s1856_s24 + $0x248] sm:$0xff] %vm938_vm1, %v904_v23 }
 0x157   : > { %v782_v24 = vpop.f32.mrb[32].mxu0  ;;  %v908_v25 = vpop.f32.mrb[32].mxu1 }
 0x158   : > { %970 = vst [vmem:[%s1856_s24 + $0x100] sm:$0xff] %v782_v24  ;;  %1012 = vst [vmem:[%s1856_s24 + $0x250] sm:$0xff] %v908_v25  ;;  %v784_v26 = vpop.f32.mrb[33].mxu0  ;;  %v910_v27 = vpop.f32.mrb[33].mxu1 }
 0x159   : > { %971 = vst.msk [vmem:[%s1856_s24 + $0x108] sm:$0xff] %vm938_vm1, %v784_v26  ;;  %1013 = vst.msk [vmem:[%s1856_s24 + $0x258] sm:$0xff] %vm938_vm1, %v910_v27 }
 0x15b   : > { %v788_v28 = vpop.f32.mrb[34].mxu0  ;;  %v914_v29 = vpop.f32.mrb[34].mxu1 }
 0x15c   : > { %972 = vst [vmem:[%s1856_s24 + $0x110] sm:$0xff] %v788_v28  ;;  %1014 = vst [vmem:[%s1856_s24 + $0x260] sm:$0xff] %v914_v29  ;;  %v790_v30 = vpop.f32.mrb[35].mxu0  ;;  %v916_v31 = vpop.f32.mrb[35].mxu1 }
 0x15d   : > { %973 = vst.msk [vmem:[%s1856_s24 + $0x118] sm:$0xff] %vm938_vm1, %v790_v30  ;;  %1015 = vst.msk [vmem:[%s1856_s24 + $0x268] sm:$0xff] %vm938_vm1, %v916_v31 }
 0x15f   : > { %v794_v32 = vpop.f32.mrb[36].mxu0  ;;  %v920_v33 = vpop.f32.mrb[36].mxu1 }
 0x160   : > { %974 = vst [vmem:[%s1856_s24 + $0x120] sm:$0xff] %v794_v32  ;;  %1016 = vst [vmem:[%s1856_s24 + $0x270] sm:$0xff] %v920_v33  ;;  %v796_v34 = vpop.f32.mrb[37].mxu0  ;;  %v922_v35 = vpop.f32.mrb[37].mxu1 }
 0x161   : > { %975 = vst.msk [vmem:[%s1856_s24 + $0x128] sm:$0xff] %vm938_vm1, %v796_v34  ;;  %1017 = vst.msk [vmem:[%s1856_s24 + $0x278] sm:$0xff] %vm938_vm1, %v922_v35 }
 0x163   : > { %v800_v36 = vpop.f32.mrb[38].mxu0  ;;  %v926_v37 = vpop.f32.mrb[38].mxu1 }
 0x164   : > { %976 = vst [vmem:[%s1856_s24 + $0x130] sm:$0xff] %v800_v36  ;;  %1018 = vst [vmem:[%s1856_s24 + $0x280] sm:$0xff] %v926_v37  ;;  %v802_v38 = vpop.f32.mrb[39].mxu0  ;;  %v928_v39 = vpop.f32.mrb[39].mxu1 }
 0x165   : > { %977 = vst.msk [vmem:[%s1856_s24 + $0x138] sm:$0xff] %vm938_vm1, %v802_v38  ;;  %1019 = vst.msk [vmem:[%s1856_s24 + $0x288] sm:$0xff] %vm938_vm1, %v928_v39 }
 0x167   : > { %v806_v40 = vpop.f32.mrb[40].mxu0  ;;  %v932_v41 = vpop.f32.mrb[40].mxu1 }
 0x168   : > { %978 = vst [vmem:[%s1856_s24 + $0x140] sm:$0xff] %v806_v40  ;;  %1020 = vst [vmem:[%s1856_s24 + $0x290] sm:$0xff] %v932_v41  ;;  %v808_v42 = vpop.f32.mrb[41].mxu0  ;;  %v934_v43 = vpop.f32.mrb[41].mxu1 }
 0x169   : > { %979 = vst.msk [vmem:[%s1856_s24 + $0x148] sm:$0xff] %vm938_vm1, %v808_v42  ;;  %1021 = vst.msk [vmem:[%s1856_s24 + $0x298] sm:$0xff] %vm938_vm1, %v934_v43 }
 0x16a PF: > { %s13_s14 = sadd.s32 1, %s1326_s14   ;;  %s1998_s12 = smov %s1322_s13 }
 0x16b   : > { %p10_p5 = scmp.ge.s32.totalorder %s13_s14, 6   ;;  %s1999_s13 = smov %s2001_s15 }
 0x16d   :  { %12 = sbr.rel (!%p10_p5) target bundleno = 2 (0x2), region = 68 }

</bundles_post_ra>
